<compile_context>
chip_gen: v6e
topology: v6e:2x2x1
jax: 0.10.0
libtpu: 0.0.40
codegen_flags: <defaults>
</compile_context>

<pallas_src>
import jax
import jax.numpy as jnp
from jax.experimental import pallas as pl
from jax.experimental.pallas import tpu as pltpu


def _round_up(a, b):
    return pl.cdiv(a, b) * b


def route_mix_kernel(pooled_ref, wrt_ref, br_ref, wexp_ref, scale_ref, w_ref):
    # pooled_ref: (1, 1, C1)   global-average-pooled input for this batch element
    # wrt_ref:    (C1, E)      routing Linear weight, pre-transposed
    # br_ref:     (1, E)       routing Linear bias
    # wexp_ref:   (E, C2, C1)  CondConv2d expert weights (k=1)
    # scale_ref:  (C2, 1)      folded BN scale (gamma / sqrt(var + eps))
    # w_ref:      (1, C2, C1)  output: BN-scaled mixed weight for this batch element
    pooled = pooled_ref[0]                                         # (1, C1)
    logits = jnp.dot(pooled, wrt_ref[...],
                     preferred_element_type=jnp.float32) + br_ref[...]   # (1, E)
    r = jax.nn.sigmoid(logits)                                     # (1, E)

    # Mix the (tiny) expert weights on the VPU: W = sum_e r_e * W_e.  E is
    # small and static, so a short unrolled Python loop is fine.
    n_experts = wexp_ref.shape[0]
    w = jnp.zeros(w_ref.shape[1:], jnp.float32)                    # (C2, C1)
    for e in range(n_experts):
        w = w + r[0:1, e:e + 1] * wexp_ref[e]                      # (1,1) broadcast

    # Fold the BN per-channel scale into the mixed weight (row-wise).
    w_ref[0] = (w * scale_ref[...]).astype(w_ref.dtype)


def conv_bn_act_kernel(w_ref, x_ref, bias_ref, o_ref):
    # w_ref:    (1, C2, C1)  BN-scaled mixed weight for this batch element
    # x_ref:    (1, C1, T)   one lane-dense spatial tile of the input
    # bias_ref: (C2, 1)      folded BN bias
    # o_ref:    (1, C2, T)
    y = jnp.dot(w_ref[0], x_ref[0], preferred_element_type=jnp.float32)   # (C2, T)
    y = y + bias_ref[...]
    o_ref[0] = (y * jax.nn.sigmoid(y)).astype(o_ref.dtype)                # SiLU


def dynamic_conv(x, wr, br, wexp, bn_gamma, bn_beta, bn_mean, bn_var,
                 eps=1e-5, lane_tile=1024):
    """x: (B, C1, H, W) float32 (NCHW, like PyTorch)."""
    B, c1, H, W = x.shape
    E, c2, _ = wexp.shape
    hw = H * W

    # ---- fold BN (inference) into per-channel scale / bias (plain-JAX glue) ----
    inv_std = 1.0 / jnp.sqrt(bn_var + eps)
    scale = (bn_gamma * inv_std).reshape(c2, 1).astype(jnp.float32)
    bias = (bn_beta - bn_mean * bn_gamma * inv_std).reshape(c2, 1).astype(jnp.float32)

    x3 = x.reshape(B, c1, hw)

    # ---- routing inputs ----
    # adaptive_avg_pool2d(x, 1).flatten(1): mean over the (unpadded!) spatial dim.
    pooled = jnp.mean(x3, axis=-1).reshape(B, 1, c1).astype(jnp.float32)
    wr_t = wr.T.astype(jnp.float32)                  # (C1, E)
    br2 = br.reshape(1, E).astype(jnp.float32)       # (1, E)

    # ---- kernel 1: routing + expert mix + BN-scale fold, once per batch elem ----
    w_mixed = pl.pallas_call(
        route_mix_kernel,
        out_shape=jax.ShapeDtypeStruct((B, c2, c1), jnp.float32),
        grid_spec=pltpu.PrefetchScalarGridSpec(
            num_scalar_prefetch=0,
            grid=(B,),
            in_specs=[
                pl.BlockSpec((1, 1, c1), lambda b: (b, 0, 0)),   # pooled
                pl.BlockSpec((c1, E), lambda b: (0, 0)),         # routing weight^T
                pl.BlockSpec((1, E), lambda b: (0, 0)),          # routing bias
                pl.BlockSpec((E, c2, c1), lambda b: (0, 0, 0)),  # expert weights
                pl.BlockSpec((c2, 1), lambda b: (0, 0)),         # BN scale
            ],
            out_specs=pl.BlockSpec((1, c2, c1), lambda b: (b, 0, 0)),
        ),
        compiler_params=pltpu.CompilerParams(dimension_semantics=("parallel",)),
    )(pooled, wr_t, br2, wexp.astype(jnp.float32), scale)

    # ---- lane-dense spatial tiling: pad HW to a multiple of 128 and tile it ----
    t = min(_round_up(hw, 128), _round_up(lane_tile, 128))   # tile size (mult of 128)
    hw_p = _round_up(hw, t)                                  # padded spatial extent
    if hw_p != hw:
        x3 = jnp.pad(x3, ((0, 0), (0, 0), (0, hw_p - hw)))   # zero-pad extra lanes
    n_t = hw_p // t

    # ---- kernel 2: 1x1 conv (single matmul) + BN bias + SiLU, tiled over (B, HW) ----
    out = pl.pallas_call(
        conv_bn_act_kernel,
        out_shape=jax.ShapeDtypeStruct((B, c2, hw_p), x.dtype),
        grid_spec=pltpu.PrefetchScalarGridSpec(
            num_scalar_prefetch=0,
            grid=(B, n_t),
            in_specs=[
                pl.BlockSpec((1, c2, c1), lambda b, i: (b, 0, 0)),   # mixed weight
                pl.BlockSpec((1, c1, t), lambda b, i: (b, 0, i)),    # x tile
                pl.BlockSpec((c2, 1), lambda b, i: (0, 0)),          # BN bias
            ],
            out_specs=pl.BlockSpec((1, c2, t), lambda b, i: (b, 0, i)),
        ),
        compiler_params=pltpu.CompilerParams(
            dimension_semantics=("parallel", "parallel")),
    )(w_mixed, x3, bias)

    return out[:, :, :hw].reshape(B, c2, H, W)


def dynamic_conv_ref(x, wr, br, wexp, bn_gamma, bn_beta, bn_mean, bn_var, eps=1e-5):
    """Pure-JAX reference matching the PyTorch forward."""
    pooled = x.mean(axis=(2, 3))                               # (B, C1)
    r = jax.nn.sigmoid(pooled @ wr.T + br)                     # (B, E)
    w_mix = jnp.einsum('be,eoc->boc', r, wexp)                 # (B, C2, C1)
    y = jnp.einsum('boc,bchw->bohw', w_mix, x)                 # (B, C2, H, W)
    scale = bn_gamma / jnp.sqrt(bn_var + eps)
    y = y * scale.reshape(1, -1, 1, 1) + (bn_beta - bn_mean * scale).reshape(1, -1, 1, 1)
    return y * jax.nn.sigmoid(y)                               # SiLU


if __name__ == "__main__":
    key = jax.random.PRNGKey(0)
    E, c1, c2 = 4, 8, 16

    ks = jax.random.split(key, 8)
    # Deterministic synthetic parameters (shapes from the module __init__).
    wr = 0.3 * jax.random.normal(ks[1], (E, c1), dtype=jnp.float32)        # routing Linear weight
    br = 0.1 * jax.random.normal(ks[2], (E,), dtype=jnp.float32)           # routing Linear bias
    wexp = 0.2 * jax.random.normal(ks[3], (E, c2, c1), dtype=jnp.float32)  # CondConv2d experts (k=1)
    bn_gamma = 1.0 + 0.1 * jax.random.normal(ks[4], (c2,), dtype=jnp.float32)
    bn_beta = 0.1 * jax.random.normal(ks[5], (c2,), dtype=jnp.float32)
    bn_mean = 0.05 * jax.random.normal(ks[6], (c2,), dtype=jnp.float32)
    bn_var = 1.0 + 0.1 * jax.random.uniform(ks[7], (c2,), dtype=jnp.float32)

    # Case 1: HW already a multiple of 128 (no padding path).
    x1 = jax.random.normal(ks[0], (2, c1, 16, 16), dtype=jnp.float32)
    out1 = jax.block_until_ready(
        dynamic_conv(x1, wr, br, wexp, bn_gamma, bn_beta, bn_mean, bn_var))
    ref1 = dynamic_conv_ref(x1, wr, br, wexp, bn_gamma, bn_beta, bn_mean, bn_var)
    assert out1.shape == (2, c2, 16, 16)
    assert jnp.allclose(out1, ref1, rtol=1e-4, atol=1e-4), "mismatch vs JAX reference (case 1)"

    # Case 2: HW not a multiple of 128 (exercises lane padding + trailing slice).
    x2 = jax.random.normal(ks[0], (2, c1, 15, 15), dtype=jnp.float32)
    out2 = jax.block_until_ready(
        dynamic_conv(x2, wr, br, wexp, bn_gamma, bn_beta, bn_mean, bn_var))
    ref2 = dynamic_conv_ref(x2, wr, br, wexp, bn_gamma, bn_beta, bn_mean, bn_var)
    assert out2.shape == (2, c2, 15, 15)
    assert jnp.allclose(out2, ref2, rtol=1e-4, atol=1e-4), "mismatch vs JAX reference (case 2)"

    print("KERNEL_OK")
</pallas_src>

<mosaic_0001>
module attributes {stable_mosaic.version = 11 : i64} {
  func.func @route_mix_kernel(%arg0: i32, %arg1: memref<1x1x8xf32, #tpu.memory_space<vmem>>, %arg2: memref<8x4xf32, #tpu.memory_space<vmem>>, %arg3: memref<1x4xf32, #tpu.memory_space<vmem>>, %arg4: memref<4x16x8xf32, #tpu.memory_space<vmem>>, %arg5: memref<16x1xf32, #tpu.memory_space<vmem>>, %arg6: memref<1x16x8xf32, #tpu.memory_space<vmem>>) attributes {dimension_semantics = [#tpu.dimension_semantics<parallel>], iteration_bounds = array<i64: 2>, scalar_prefetch = 0 : i64, scratch_operands = 0 : i64, tpu.core_type = #tpu.core_type<tc>, window_params = [{transform_indices = @transform_0, window_bounds = array<i64: 1, 1, 8>}, {pipeline_mode = #tpu.pipeline_mode<synchronous>, transform_indices = @transform_1, window_bounds = array<i64: 8, 4>}, {pipeline_mode = #tpu.pipeline_mode<synchronous>, transform_indices = @transform_2, window_bounds = array<i64: 1, 4>}, {pipeline_mode = #tpu.pipeline_mode<synchronous>, transform_indices = @transform_3, window_bounds = array<i64: 4, 16, 8>}, {pipeline_mode = #tpu.pipeline_mode<synchronous>, transform_indices = @transform_4, window_bounds = array<i64: 16, 1>}, {transform_indices = @transform_5, window_bounds = array<i64: 1, 16, 8>}]} {
    %c0 = arith.constant 0 : index
    %c0_0 = arith.constant 0 : index
    %c0_1 = arith.constant 0 : index
    %0 = vector.load %arg1[%c0, %c0_0, %c0_1] : memref<1x1x8xf32, #tpu.memory_space<vmem>>, vector<1x1x8xf32>
    %1 = vector.shape_cast %0 : vector<1x1x8xf32> to vector<1x8xf32>
    %c0_2 = arith.constant 0 : index
    %c0_3 = arith.constant 0 : index
    %2 = vector.load %arg2[%c0_2, %c0_3] : memref<8x4xf32, #tpu.memory_space<vmem>>, vector<8x4xf32>
    %cst = arith.constant dense<0.000000e+00> : vector<1x4xf32>
    %3 = tpu.matmul %1, %2, %cst {dimension_numbers = #tpu.dot_dimension_numbers<[1], [0], [0], [1], [0, 0, 1, 1], [], []>} : vector<1x8xf32>, vector<8x4xf32>, vector<1x4xf32> -> vector<1x4xf32>
    %c0_4 = arith.constant 0 : index
    %c0_5 = arith.constant 0 : index
    %4 = vector.load %arg3[%c0_4, %c0_5] : memref<1x4xf32, #tpu.memory_space<vmem>>, vector<1x4xf32>
    %5 = arith.addf %3, %4 : vector<1x4xf32>
    %6 = arith.negf %5 : vector<1x4xf32>
    %7 = math.exp %6 : vector<1x4xf32>
    %cst_6 = arith.constant 1.000000e+00 : f32
    %8 = vector.broadcast %cst_6 : f32 to vector<1x4xf32>
    %9 = arith.addf %8, %7 : vector<1x4xf32>
    %10 = arith.divf %8, %9 : vector<1x4xf32>
    %cst_7 = arith.constant 0.000000e+00 : f32
    %11 = vector.broadcast %cst_7 : f32 to vector<16x8xf32>
    %12 = vector.extract_strided_slice %10 {offsets = [0, 0], sizes = [1, 1], strides = [1, 1]} : vector<1x4xf32> to vector<1x1xf32>
    %c0_8 = arith.constant 0 : index
    %c0_9 = arith.constant 0 : index
    %c0_10 = arith.constant 0 : index
    %13 = vector.load %arg4[%c0_8, %c0_9, %c0_10] : memref<4x16x8xf32, #tpu.memory_space<vmem>>, vector<1x16x8xf32>
    %14 = vector.shape_cast %13 : vector<1x16x8xf32> to vector<16x8xf32>
    %15 = vector.broadcast %12 : vector<1x1xf32> to vector<16x8xf32>
    %16 = arith.mulf %15, %14 : vector<16x8xf32>
    %17 = arith.addf %11, %16 : vector<16x8xf32>
    %18 = vector.extract_strided_slice %10 {offsets = [0, 1], sizes = [1, 1], strides = [1, 1]} : vector<1x4xf32> to vector<1x1xf32>
    %c1 = arith.constant 1 : index
    %c0_11 = arith.constant 0 : index
    %c0_12 = arith.constant 0 : index
    %19 = vector.load %arg4[%c1, %c0_11, %c0_12] : memref<4x16x8xf32, #tpu.memory_space<vmem>>, vector<1x16x8xf32>
    %20 = vector.shape_cast %19 : vector<1x16x8xf32> to vector<16x8xf32>
    %21 = vector.broadcast %18 : vector<1x1xf32> to vector<16x8xf32>
    %22 = arith.mulf %21, %20 : vector<16x8xf32>
    %23 = arith.addf %17, %22 : vector<16x8xf32>
    %24 = vector.extract_strided_slice %10 {offsets = [0, 2], sizes = [1, 1], strides = [1, 1]} : vector<1x4xf32> to vector<1x1xf32>
    %c2 = arith.constant 2 : index
    %c0_13 = arith.constant 0 : index
    %c0_14 = arith.constant 0 : index
    %25 = vector.load %arg4[%c2, %c0_13, %c0_14] : memref<4x16x8xf32, #tpu.memory_space<vmem>>, vector<1x16x8xf32>
    %26 = vector.shape_cast %25 : vector<1x16x8xf32> to vector<16x8xf32>
    %27 = vector.broadcast %24 : vector<1x1xf32> to vector<16x8xf32>
    %28 = arith.mulf %27, %26 : vector<16x8xf32>
    %29 = arith.addf %23, %28 : vector<16x8xf32>
    %30 = vector.extract_strided_slice %10 {offsets = [0, 3], sizes = [1, 1], strides = [1, 1]} : vector<1x4xf32> to vector<1x1xf32>
    %c3 = arith.constant 3 : index
    %c0_15 = arith.constant 0 : index
    %c0_16 = arith.constant 0 : index
    %31 = vector.load %arg4[%c3, %c0_15, %c0_16] : memref<4x16x8xf32, #tpu.memory_space<vmem>>, vector<1x16x8xf32>
    %32 = vector.shape_cast %31 : vector<1x16x8xf32> to vector<16x8xf32>
    %33 = vector.broadcast %30 : vector<1x1xf32> to vector<16x8xf32>
    %34 = arith.mulf %33, %32 : vector<16x8xf32>
    %35 = arith.addf %29, %34 : vector<16x8xf32>
    %c0_17 = arith.constant 0 : index
    %c0_18 = arith.constant 0 : index
    %36 = vector.load %arg5[%c0_17, %c0_18] : memref<16x1xf32, #tpu.memory_space<vmem>>, vector<16x1xf32>
    %37 = vector.broadcast %36 : vector<16x1xf32> to vector<16x8xf32>
    %38 = arith.mulf %35, %37 : vector<16x8xf32>
    %c0_19 = arith.constant 0 : index
    %c0_20 = arith.constant 0 : index
    %c0_21 = arith.constant 0 : index
    %39 = vector.load %arg6[%c0_19, %c0_20, %c0_21] : memref<1x16x8xf32, #tpu.memory_space<vmem>>, vector<1x16x8xf32>
    %40 = vector.shape_cast %39 : vector<1x16x8xf32> to vector<16x8xf32>
    %41 = vector.shape_cast %38 : vector<16x8xf32> to vector<1x16x8xf32>
    tpu.vector_store %arg6[%c0_19, %c0_20, %c0_21], %41 {strides = array<i32>} : memref<1x16x8xf32, #tpu.memory_space<vmem>>, vector<1x16x8xf32>,
    return
  }
  func.func @transform_0(%arg0: i32) -> (i32, i32, i32) {
    %c0_i32 = arith.constant 0 : i32
    %c0_i32_0 = arith.constant 0 : i32
    %c0_i32_1 = arith.constant 0 : i32
    return %arg0, %c0_i32, %c0_i32_0 : i32, i32, i32
  }
  func.func @transform_1(%arg0: i32) -> (i32, i32) {
    %c0_i32 = arith.constant 0 : i32
    %c0_i32_0 = arith.constant 0 : i32
    %c0_i32_1 = arith.constant 0 : i32
    return %c0_i32, %c0_i32_0 : i32, i32
  }
  func.func @transform_2(%arg0: i32) -> (i32, i32) {
    %c0_i32 = arith.constant 0 : i32
    %c0_i32_0 = arith.constant 0 : i32
    %c0_i32_1 = arith.constant 0 : i32
    return %c0_i32, %c0_i32_0 : i32, i32
  }
  func.func @transform_3(%arg0: i32) -> (i32, i32, i32) {
    %c0_i32 = arith.constant 0 : i32
    %c0_i32_0 = arith.constant 0 : i32
    %c0_i32_1 = arith.constant 0 : i32
    %c0_i32_2 = arith.constant 0 : i32
    return %c0_i32, %c0_i32_0, %c0_i32_1 : i32, i32, i32
  }
  func.func @transform_4(%arg0: i32) -> (i32, i32) {
    %c0_i32 = arith.constant 0 : i32
    %c0_i32_0 = arith.constant 0 : i32
    %c0_i32_1 = arith.constant 0 : i32
    return %c0_i32, %c0_i32_0 : i32, i32
  }
  func.func @transform_5(%arg0: i32) -> (i32, i32, i32) {
    %c0_i32 = arith.constant 0 : i32
    %c0_i32_0 = arith.constant 0 : i32
    %c0_i32_1 = arith.constant 0 : i32
    return %arg0, %c0_i32, %c0_i32_0 : i32, i32, i32
  }
}

</mosaic_0001>

<bundles_post_ra>
// kernel: tpu_custom_call.1
= control target key start
LH: loop header
LB: loop body
LE: loop exit
PB: predicated region body
PF: predicated region fallthrough
CT: control target
= control target key end

     0   :  { %s513_s18 = smov 0   ;;  %s573_s0 = inlined_call_operand.vmem [shape: f32[2,1,8], index: 0, kind: input, shape index: {}]   ;;  %s574_s1 = inlined_call_operand.vmem [shape: f32[8,4], index: 1, kind: input, shape index: {}]   ;;  %s575_s2 = inlined_call_operand.vmem [shape: f32[1,4], index: 2, kind: input, shape index: {}]   ;;  %s576_s3 = inlined_call_operand.vmem [shape: f32[4,16,8], index: 3, kind: input, shape index: {}]   ;;  %s577_s4 = inlined_call_operand.vmem [shape: f32[16,1], index: 4, kind: input, shape index: {}]   ;;  %s578_s5 = inlined_call_operand.vmem [shape: f32[2,16,8], index: 5, kind: output, shape index: {}]  }
   0x1 LB: > { %s416_s19 = sadd.s32 4294967295, %s475_s18   ;;  %p420_p0 = scmp.ge.s32.totalorder %s475_s18, 1  ;;  %s475_s18 = sphi %s513_s18, %s15_s18  }
   0x2   : > { %p185_p1 = scmp.lt.s32.totalorder %s475_s18, 3 }
   0x4   : > { %p186_p2 = pnand %p420_p0, %p185_p1 }
   0x5   : > { %p211_p3 = scmp.lt.s32.totalorder (!%p186_p2), %s416_s19, 1  ;;  %s480_s27 = smov (!%p186_p2), 125  }
   0x6   : > { %189 = sbr.rel (%p186_p2) target bundleno = 420 (0x1a4), region = 40  ;;  %s481_s28 = smov (!%p186_p2), 127  }
   0x7   : > { %s482_s6 = smov (!%p186_p2), 126  }
   0xb   : > { %v220_v0 = vld [vmem:[%s574_s1] sm:$0xff]  ;;  %v477_v1 = vmov 0.0   ;;  %vm478_vm0 = vmmov 0   ;;  %s580_s19 = smov (!%p211_p3, %s416_s19), 1  ;;  %vm222_vm1 = vcmask 64512   ;;  %v479_v3 = vmov 0  }
   0xc   : > { %436 = vmatprep.subr.mxu0 %v477_v1  ;;  %438 = vmatprep.mubr.msk.f32.mxu0 %vm478_vm0, %v477_v1  ;;  %s213_s24 = scalar_lea.vmem %s573_s0, %s580_s19  ;;  %v221_v4 = vld [vmem:[%s575_s2] sm:$0x1]  ;;  %v349_v13 = vld [vmem:[%s577_s4 + $0x8] sm:$0xff]  ;;  %v425_v17 = vld [vmem:[%s576_s3 + $0x10] sm:$0xff] }
   0xd   : > { %437 = vmatpush3.msra.mxu0 %v220_v0  ;;  %v219_v2 = vld [vmem:[%s213_s24] sm:$0x1]  ;;  %464 = vset.pattern.permute.xlu0 %v479_v3  ;;  %v426_v18 = vld [vmem:[%s576_s3 + $0x18] sm:$0xff]  ;;  %v303_v21 = vld [vmem:[%s576_s3 + $0x8] sm:$0xff] }
   0xe   : > { %439 = vmatmul.mubr.msk.f32.vlgmr.msra.gmra.mxu0 %vm222_vm1, %v219_v2  ;;  %463 = vset.pattern.permute.xlu1 %v479_v3  ;;  %v348_v12 = vld [vmem:[%s577_s4] sm:$0xff]  ;;  %v428_v27 = vld [vmem:[%s576_s3 + $0x28] sm:$0xff]  ;;  %v429_v31 = vld [vmem:[%s576_s3 + $0x30] sm:$0xff] }
   0xf   : > { %v302_v19 = vld [vmem:[%s576_s3] sm:$0xff]  ;;  %v430_v32 = vld [vmem:[%s576_s3 + $0x38] sm:$0xff] }
  0x10   : > { %v427_v26 = vld [vmem:[%s576_s3 + $0x20] sm:$0xff] }
  0xce   : > { %v292_v5 = vpop.f32.mrf.mxu0 }
  0xcf   : > { %v293_v6 = vadd.f32 %v292_v5, %v221_v4 }
  0xd0   : > { %v440_v7 = vpop.f32.mrf.mxu0 }
  0xd1   : > { %v424_v8 = vmul.f32 -1.442695, %v293_v6 }
  0xd3   : > { %465 = vpow2.f32 %v424_v8 }
  0xe0   : > { %v466_v9 = vpop.eup %465 }
  0xe1   : > { %v299_v10 = vadd.f32 1.0, %v466_v9 }
  0xe3   : > { %467 = vrcp.f32 %v299_v10 }
  0xf0   : > { %v468_v11 = vpop.eup %467 }
  0xf1   : > { %339 = vrot.lane.b32.xlu1 %v468_v11, %s480_s27  ;;  %315 = vrot.lane.b32.xlu0 %v468_v11, %s481_s28  ;;  %441 = vpush %v468_v11 }
  0xf5   : > { %327 = vrot.lane.b32.xlu0 %v468_v11, %s482_s6  ;;  %352 = vperm.xlu1 %463, %v348_v12   ;;  %s433_s6 = sshll.u32 %s580_s19, 4 }
  0xf9   : > { %357 = vperm.xlu0 %464, %v349_v13  }
 0x122   : > { %s442_s9 = spop %441 }
 0x123   : > { %v306_v20 = vstv %s442_s9  ;;  %s218_s9 = scalar_lea.vmem %s578_s5, %s433_s6 }
 0x124   : > { %v308_v25 = vmul.f32 %v306_v20, %v302_v19  ;;  %v309_v28 = vmul.f32 %v306_v20, %v303_v21 }
 0x163   : > { %v316_v14 = vpop.permute.xlu0 %315  ;;  %v340_v16 = vpop.permute.xlu1 %339 }
 0x164   : > { %443 = vpush %v316_v14 }
 0x167   : > { %v328_v15 = vpop.permute.xlu0 %327 }
 0x168   : > { %445 = vpush %v328_v15 }
 0x169   : > { %447 = vpush %v340_v16 }
 0x170   : > { %v353_v41 = vpop.permute.xlu1 %352 }
 0x174   : > { %v358_v42 = vpop.permute.xlu0 %357 }
 0x195   : > { %s444_s16 = spop %443 }
 0x196   : > { %v318_v22 = vstv %s444_s16 }
 0x197   : > { %v320_v23 = vmul.f32 %v425_v17, %v318_v22  ;;  %v321_v24 = vmul.f32 %v426_v18, %v318_v22 }
 0x199   : > { %s446_s25 = spop %445  ;;  %v322_v29 = vadd.f32 %v320_v23, %v308_v25  ;;  %v323_v33 = vadd.f32 %v321_v24, %v309_v28 }
 0x19a   : > { %v330_v30 = vstv %s446_s25  ;;  %s448_s30 = spop %447 }
 0x19b   : > { %v332_v34 = vmul.f32 %v427_v26, %v330_v30  ;;  %v333_v35 = vmul.f32 %v428_v27, %v330_v30  ;;  %v342_v36 = vstv %s448_s30 }
 0x19c   : > { %v344_v39 = vmul.f32 %v429_v31, %v342_v36  ;;  %v345_v40 = vmul.f32 %v430_v32, %v342_v36 }
 0x19d   : > { %v334_v37 = vadd.f32 %v332_v34, %v322_v29  ;;  %v335_v38 = vadd.f32 %v333_v35, %v323_v33 }
 0x19f   : > { %v346_v43 = vadd.f32 %v344_v39, %v334_v37  ;;  %v347_v44 = vadd.f32 %v345_v40, %v335_v38 }
 0x1a1   : > { %v360_v45 = vmul.f32 %v353_v41, %v346_v43  ;;  %v361_v46 = vmul.f32 %v358_v42, %v347_v44 }
 0x1a3   : > { %362 = vst.msk [vmem:[%s218_s9] sm:$0xff] %vm222_vm1, %v360_v45  ;;  %363 = vst.msk [vmem:[%s218_s9 + $0x8] sm:$0xff] %vm222_vm1, %v361_v46 }
 0x1a4 PF: > { %s15_s18 = sadd.s32 1, %s475_s18  }
 0x1a5   : > { %p12_p4 = scmp.ge.s32.totalorder %s15_s18, 4  }
 0x1a7   :  { %14 = sbr.rel (!%p12_p4) target bundleno = 1 (0x1), region = 73 }

</bundles_post_ra>
